<compile_context>
chip_gen: v7x
topology: tpu7x:2x2x1
jax: 0.10.0
libtpu: 0.0.40
codegen_flags: <defaults>
</compile_context>

<pallas_src>
import functools

import jax
import jax.numpy as jnp
from jax.experimental import pallas as pl
from jax.experimental.pallas import tpu as pltpu


def _round_up(x: int, m: int) -> int:
    return (x + m - 1) // m * m


def _rcs_loss_kernel(logits_ref, angle_ref, out_ref, acc_ref, *,
                     num_bins: int, bin_width: float, alpha: float,
                     regression: str, total_b: int, tile_b: int,
                     inner_steps: int):
    c = pl.program_id(0)      # batch-chunk axis ("parallel": split across TCs on v7x)
    i = pl.program_id(1)      # batch-tile axis  ("arbitrary": accumulator axis)

    # Zero the resident lane-dense accumulator at the start of each chunk.
    @pl.when(i == 0)
    def _zero():
        acc_ref[...] = jnp.zeros_like(acc_ref)

    logits = logits_ref[...].astype(jnp.float32)      # (num_bins, TB)  bins x samples
    angle = angle_ref[...]                            # (1, TB) f32
    nb, tb = logits.shape

    # Validity mask for padded columns (lane-dense (1, TB)).
    col0 = (c * inner_steps + i) * tile_b
    col = col0 + jax.lax.broadcasted_iota(jnp.int32, (1, tb), 1)
    valid = (col < total_b).astype(jnp.float32)       # (1, TB)

    # --- probs = softmax over bins (sublane axis); one reciprocal per sample ----
    m = jnp.max(logits, axis=0, keepdims=True)        # (1, TB)
    e = jnp.exp(logits - m)                           # (NB, TB)
    denom = jnp.sum(e, axis=0, keepdims=True)         # (1, TB), >= 1
    inv = pl.reciprocal(denom, approx=True)           # EUP vrcp
    inv = inv * (2.0 - denom * inv)                   # one Newton step -> ~f32 exact
    probs = e * inv                                   # (NB, TB)

    # --- bin_target = clamp(floor((angle + half_range)/bin_width)) --------------
    half_range = num_bins * bin_width / 2.0
    idx = jnp.floor((angle + half_range) * (1.0 / bin_width))
    idx = jnp.clip(idx, 0.0, float(num_bins - 1)).astype(jnp.int32)   # (1, TB)

    # --- cls loss: CrossEntropyLoss applied to probs (torch quirk kept).
    #     probs in (0,1] -> no max-subtraction needed for this log-sum-exp.
    bins = jax.lax.broadcasted_iota(jnp.int32, (nb, tb), 0)           # (NB, TB)
    picked = jnp.sum(jnp.where(bins == idx, probs, 0.0),
                     axis=0, keepdims=True)                           # (1, TB)
    lse = jnp.log(jnp.sum(jnp.exp(probs), axis=0, keepdims=True))     # (1, TB)
    ce = lse - picked                                                 # (1, TB)

    # --- regression loss on expected angle ---------------------------------------
    offsets = bins.astype(jnp.float32) - (num_bins - 1) / 2.0         # (NB, TB)
    expected = bin_width * jnp.sum(probs * offsets, axis=0, keepdims=True)
    diff = expected - angle
    if regression == 'mae':
        reg = jnp.abs(diff)
    else:  # 'mse'
        reg = diff * diff

    # --- deferred reduction: lane-dense accumulate; collapse only at the end -----
    acc_ref[...] += (ce + alpha * reg) * valid

    @pl.when(i == inner_steps - 1)
    def _finalize():
        out_ref[...] = jnp.reshape(jnp.sum(acc_ref[...]), (1, 1, 1))


def rcs_loss(logits, angle_target, *, num_bins: int, bin_width: float = 3.0,
             alpha: float = 1.0, regression: str = 'mae',
             tile_b: int = 32768, num_splits: int = 2):
    """Combined CE + MAE/MSE loss; returns a scalar float32."""
    regression = regression.lower()
    if regression not in ('mae', 'mse'):
        raise ValueError("regression must be 'mae' or 'mse'")
    if logits.shape[1] != num_bins:
        raise ValueError(f'logits second dim ({logits.shape[1]}) != num_bins ({num_bins})')
    num_splits = max(1, int(num_splits))

    b = logits.shape[0]
    itemsize = jnp.dtype(logits.dtype).itemsize

    # Lane-dense layout: bins -> sublanes, batch -> lanes. logits keep their
    # original dtype (bf16 stays bf16); the kernel casts on load.
    logits_t = jnp.transpose(logits)                               # (num_bins, B)
    # torch .squeeze() emulation: any shape with B elements becomes a (1, B) row.
    angle_row = jnp.reshape(angle_target, (1, b)).astype(jnp.float32)

    # Tile sizing: lanes must be a multiple of 128; size each split's tile so a
    # split never covers far more than its share of the batch.
    per_split = -(-b // num_splits)
    tb = max(128, min(_round_up(tile_b, 128), _round_up(per_split, 128)))
    bp = _round_up(b, num_splits * tb)
    inner_steps = bp // (num_splits * tb)
    if bp != b:
        # Pad only on the lane axis (fuses with the transpose copy); zeros keep
        # all math finite and `valid` removes their contribution.
        logits_t = jnp.pad(logits_t, ((0, 0), (0, bp - b)))
        angle_row = jnp.pad(angle_row, ((0, 0), (0, bp - b)))

    kernel = functools.partial(
        _rcs_loss_kernel,
        num_bins=num_bins, bin_width=float(bin_width), alpha=float(alpha),
        regression=regression, total_b=b, tile_b=tb, inner_steps=inner_steps)

    # VMEM budget with *padded* block footprints (double-buffered inputs).
    sub = 8 * max(1, 4 // itemsize)
    pbins = _round_up(num_bins, sub)
    vmem_need = (2 * pbins * tb * itemsize      # logits blocks (double-buffered)
                 + 2 * 8 * tb * 4               # angle blocks (sublane-padded)
                 + 8 * tb * 4                   # lane-dense accumulator scratch
                 + (4 << 20))                   # headroom
    vmem_limit = int(min(max(vmem_need, 16 << 20), 96 << 20))

    cost = pl.CostEstimate(
        flops=12 * b * num_bins,
        transcendentals=2 * b * num_bins + 3 * b,   # two exp passes + per-row log/recip
        bytes_accessed=b * num_bins * itemsize + b * 4 + num_splits * 4,
    )

    grid = (num_splits, inner_steps)
    partials = pl.pallas_call(
        kernel,
        out_shape=jax.ShapeDtypeStruct((num_splits, 1, 1), jnp.float32),
        grid_spec=pltpu.PrefetchScalarGridSpec(
            num_scalar_prefetch=0,
            grid=grid,
            in_specs=[
                pl.BlockSpec((num_bins, tb), lambda c, i: (0, c * inner_steps + i)),
                pl.BlockSpec((1, tb), lambda c, i: (0, c * inner_steps + i)),
            ],
            out_specs=pl.BlockSpec((1, 1, 1), lambda c, i: (c, 0, 0)),
            scratch_shapes=[pltpu.VMEM((1, tb), jnp.float32)],
        ),
        compiler_params=pltpu.CompilerParams(
            dimension_semantics=("parallel", "arbitrary"),
            vmem_limit_bytes=vmem_limit),
        cost_estimate=cost,
    )(logits_t, angle_row)

    return jnp.sum(partials) / b


def _rcs_loss_ref(logits, angle_target, *, num_bins, bin_width=3.0,
                  alpha=1.0, regression='mae'):
    """Pure-JAX reference of the PyTorch forward, for verification."""
    angle = jnp.reshape(angle_target, (-1,)).astype(jnp.float32)
    probs = jax.nn.softmax(logits.astype(jnp.float32), axis=1)
    half_range = num_bins * bin_width / 2.0
    idx = jnp.clip(jnp.floor((angle + half_range) / bin_width),
                   0, num_bins - 1).astype(jnp.int32)
    logp = jax.nn.log_softmax(probs, axis=1)          # torch quirk: CE on probs
    cls_loss = -jnp.mean(jnp.take_along_axis(logp, idx[:, None], axis=1))
    offsets = jnp.arange(num_bins, dtype=jnp.float32) - (num_bins - 1) / 2.0
    expected = bin_width * jnp.sum(probs * offsets[None, :], axis=1)
    if regression == 'mae':
        reg_loss = jnp.mean(jnp.abs(expected - angle))
    else:
        reg_loss = jnp.mean((expected - angle) ** 2)
    return cls_loss + alpha * reg_loss


if __name__ == "__main__":
    NUM_BINS = 16
    BIN_WIDTH = 3.0

    key = jax.random.PRNGKey(0)
    k1, k2, k3, k4, k5, k6 = jax.random.split(key, 6)

    # Test 1: small batch, single tile per split, MAE.
    B = 8
    logits = jax.random.normal(k1, (B, NUM_BINS), dtype=jnp.float32)
    angle_target = jax.random.uniform(k2, (B, 1), dtype=jnp.float32,
                                      minval=-20.0, maxval=20.0)
    loss = rcs_loss(logits, angle_target, num_bins=NUM_BINS, bin_width=BIN_WIDTH,
                    alpha=1.0, regression='mae')
    loss = jax.block_until_ready(loss)
    ref = _rcs_loss_ref(logits, angle_target, num_bins=NUM_BINS,
                        bin_width=BIN_WIDTH, alpha=1.0, regression='mae')
    assert jnp.allclose(loss, ref, rtol=1e-5, atol=1e-5), (loss, ref)

    # Test 2: ragged batch (masking path) + MSE + one fully padded split chunk.
    B2 = 13
    logits2 = jax.random.normal(k3, (B2, NUM_BINS), dtype=jnp.float32)
    angle2 = jax.random.uniform(k4, (B2, 1), dtype=jnp.float32,
                                minval=-20.0, maxval=20.0)
    loss2 = rcs_loss(logits2, angle2, num_bins=NUM_BINS, bin_width=BIN_WIDTH,
                     alpha=0.5, regression='mse', tile_b=128)
    loss2 = jax.block_until_ready(loss2)
    ref2 = _rcs_loss_ref(logits2, angle2, num_bins=NUM_BINS, bin_width=BIN_WIDTH,
                         alpha=0.5, regression='mse')
    assert jnp.allclose(loss2, ref2, rtol=1e-5, atol=1e-5), (loss2, ref2)

    # Test 3: multi-tile accumulation within each split chunk (inner_steps > 1).
    B3 = 300
    logits3 = jax.random.normal(k5, (B3, NUM_BINS), dtype=jnp.float32)
    angle3 = jax.random.uniform(k6, (B3,), dtype=jnp.float32,
                                minval=-20.0, maxval=20.0)
    loss3 = rcs_loss(logits3, angle3, num_bins=NUM_BINS, bin_width=BIN_WIDTH,
                     alpha=1.0, regression='mae', tile_b=128)
    loss3 = jax.block_until_ready(loss3)
    ref3 = _rcs_loss_ref(logits3, angle3, num_bins=NUM_BINS, bin_width=BIN_WIDTH,
                         alpha=1.0, regression='mae')
    assert jnp.allclose(loss3, ref3, rtol=1e-4, atol=1e-5), (loss3, ref3)

    print("KERNEL_OK")
</pallas_src>

<mosaic_0001>
module attributes {stable_mosaic.version = 11 : i64} {
  func.func @_rcs_loss_kernel(%arg0: i32, %arg1: i32, %arg2: memref<16x128xf32, #tpu.memory_space<vmem>>, %arg3: memref<1x128xf32, #tpu.memory_space<vmem>>, %arg4: memref<1x1x1xf32, #tpu.memory_space<vmem>>, %arg5: memref<1x128xf32, #tpu.memory_space<vmem>>) attributes {dimension_semantics = [#tpu.dimension_semantics<parallel>, #tpu.dimension_semantics<arbitrary>], iteration_bounds = array<i64: 2, 1>, scalar_prefetch = 0 : i64, scratch_operands = 1 : i64, tpu.core_type = #tpu.core_type<tc>, window_params = [{transform_indices = @transform_0, window_bounds = array<i64: 16, 128>}, {transform_indices = @transform_1, window_bounds = array<i64: 1, 128>}, {transform_indices = @transform_2, window_bounds = array<i64: 1, 1, 1>}]} {
    %c0_i32 = arith.constant 0 : i32
    %0 = arith.cmpi eq, %arg1, %c0_i32 : i32
    %1 = arith.extui %0 : i1 to i32
    %c0_i32_0 = arith.constant 0 : i32
    %2 = arith.cmpi ne, %1, %c0_i32_0 : i32
    scf.if %2 {
      %cst_23 = arith.constant 0.000000e+00 : f32
      %71 = vector.broadcast %cst_23 : f32 to vector<1x128xf32>
      %c0_24 = arith.constant 0 : index
      %c0_25 = arith.constant 0 : index
      %72 = vector.load %arg5[%c0_24, %c0_25] : memref<1x128xf32, #tpu.memory_space<vmem>>, vector<1x128xf32>
      tpu.vector_store %arg5[%c0_24, %c0_25], %71 {strides = array<i32>} : memref<1x128xf32, #tpu.memory_space<vmem>>, vector<1x128xf32>,
    } else {
    }
    %c0 = arith.constant 0 : index
    %c0_1 = arith.constant 0 : index
    %3 = vector.load %arg2[%c0, %c0_1] : memref<16x128xf32, #tpu.memory_space<vmem>>, vector<16x128xf32>
    %c0_2 = arith.constant 0 : index
    %c0_3 = arith.constant 0 : index
    %4 = vector.load %arg3[%c0_2, %c0_3] : memref<1x128xf32, #tpu.memory_space<vmem>>, vector<1x128xf32>
    %c1_i32 = arith.constant 1 : i32
    %5 = arith.muli %arg0, %c1_i32 : i32
    %6 = arith.addi %5, %arg1 : i32
    %c128_i32 = arith.constant 128 : i32
    %7 = arith.muli %6, %c128_i32 : i32
    %8 = tpu.iota {dimensions = array<i32: 1>} : vector<1x128xi32>
    %9 = vector.broadcast %7 : i32 to vector<1x128xi32>
    %10 = arith.addi %9, %8 : vector<1x128xi32>
    %c8_i32 = arith.constant 8 : i32
    %11 = vector.broadcast %c8_i32 : i32 to vector<1x128xi32>
    %12 = arith.cmpi slt, %10, %11 : vector<1x128xi32>
    %13 = arith.extui %12 : vector<1x128xi1> to vector<1x128xi32>
    %14 = arith.sitofp %13 : vector<1x128xi32> to vector<1x128xf32>
    %cst = arith.constant dense<0xFF800000> : vector<128xf32>
    %15 = vector.multi_reduction <maximumf>, %3, %cst [0] : vector<16x128xf32> to vector<128xf32>
    %16 = vector.shape_cast %15 : vector<128xf32> to vector<1x128xf32>
    %17 = vector.broadcast %16 : vector<1x128xf32> to vector<16x128xf32>
    %18 = arith.subf %3, %17 : vector<16x128xf32>
    %19 = math.exp %18 : vector<16x128xf32>
    %cst_4 = arith.constant dense<0.000000e+00> : vector<128xf32>
    %20 = vector.multi_reduction <add>, %19, %cst_4 [0] : vector<16x128xf32> to vector<128xf32>
    %21 = vector.shape_cast %20 : vector<128xf32> to vector<1x128xf32>
    %22 = tpu.reciprocal %21 {approx = true} : vector<1x128xf32> -> vector<1x128xf32>
    %23 = arith.mulf %21, %22 : vector<1x128xf32>
    %cst_5 = arith.constant 2.000000e+00 : f32
    %24 = vector.broadcast %cst_5 : f32 to vector<1x128xf32>
    %25 = arith.subf %24, %23 : vector<1x128xf32>
    %26 = arith.mulf %22, %25 : vector<1x128xf32>
    %27 = vector.broadcast %26 : vector<1x128xf32> to vector<16x128xf32>
    %28 = arith.mulf %19, %27 : vector<16x128xf32>
    %cst_6 = arith.constant 2.400000e+01 : f32
    %29 = vector.broadcast %cst_6 : f32 to vector<1x128xf32>
    %30 = arith.addf %4, %29 : vector<1x128xf32>
    %cst_7 = arith.constant 0.333333343 : f32
    %31 = vector.broadcast %cst_7 : f32 to vector<1x128xf32>
    %32 = arith.mulf %30, %31 : vector<1x128xf32>
    %33 = math.floor %32 : vector<1x128xf32>
    %cst_8 = arith.constant 0.000000e+00 : f32
    %cst_9 = arith.constant 1.500000e+01 : f32
    %34 = vector.broadcast %cst_8 : f32 to vector<1x128xf32>
    %35 = arith.maximumf %34, %33 : vector<1x128xf32>
    %36 = vector.broadcast %cst_9 : f32 to vector<1x128xf32>
    %37 = arith.minimumf %36, %35 : vector<1x128xf32>
    %38 = arith.fptosi %37 : vector<1x128xf32> to vector<1x128xi32>
    %39 = tpu.iota {dimensions = array<i32: 0>} : vector<16x128xi32>
    %40 = vector.broadcast %38 : vector<1x128xi32> to vector<16x128xi32>
    %41 = arith.cmpi eq, %39, %40 : vector<16x128xi32>
    %cst_10 = arith.constant 0.000000e+00 : f32
    %42 = vector.broadcast %cst_10 : f32 to vector<16x128xf32>
    %43 = arith.select %41, %28, %42 : vector<16x128xi1>, vector<16x128xf32>
    %cst_11 = arith.constant dense<0.000000e+00> : vector<128xf32>
    %44 = vector.multi_reduction <add>, %43, %cst_11 [0] : vector<16x128xf32> to vector<128xf32>
    %45 = vector.shape_cast %44 : vector<128xf32> to vector<1x128xf32>
    %46 = math.exp %28 : vector<16x128xf32>
    %cst_12 = arith.constant dense<0.000000e+00> : vector<128xf32>
    %47 = vector.multi_reduction <add>, %46, %cst_12 [0] : vector<16x128xf32> to vector<128xf32>
    %48 = vector.shape_cast %47 : vector<128xf32> to vector<1x128xf32>
    %49 = math.log %48 : vector<1x128xf32>
    %50 = arith.subf %49, %45 : vector<1x128xf32>
    %51 = arith.sitofp %39 : vector<16x128xi32> to vector<16x128xf32>
    %cst_13 = arith.constant 7.500000e+00 : f32
    %52 = vector.broadcast %cst_13 : f32 to vector<16x128xf32>
    %53 = arith.subf %51, %52 : vector<16x128xf32>
    %54 = arith.mulf %28, %53 : vector<16x128xf32>
    %cst_14 = arith.constant dense<0.000000e+00> : vector<128xf32>
    %55 = vector.multi_reduction <add>, %54, %cst_14 [0] : vector<16x128xf32> to vector<128xf32>
    %56 = vector.shape_cast %55 : vector<128xf32> to vector<1x128xf32>
    %cst_15 = arith.constant 3.000000e+00 : f32
    %57 = vector.broadcast %cst_15 : f32 to vector<1x128xf32>
    %58 = arith.mulf %57, %56 : vector<1x128xf32>
    %59 = arith.subf %58, %4 : vector<1x128xf32>
    %60 = math.absf %59 : vector<1x128xf32>
    %c0_16 = arith.constant 0 : index
    %c0_17 = arith.constant 0 : index
    %61 = vector.load %arg5[%c0_16, %c0_17] : memref<1x128xf32, #tpu.memory_space<vmem>>, vector<1x128xf32>
    %cst_18 = arith.constant 1.000000e+00 : f32
    %62 = vector.broadcast %cst_18 : f32 to vector<1x128xf32>
    %63 = arith.mulf %62, %60 : vector<1x128xf32>
    %64 = arith.addf %50, %63 : vector<1x128xf32>
    %65 = arith.mulf %64, %14 : vector<1x128xf32>
    %66 = arith.addf %61, %65 : vector<1x128xf32>
    %c0_19 = arith.constant 0 : index
    %c0_20 = arith.constant 0 : index
    %67 = vector.load %arg5[%c0_19, %c0_20] : memref<1x128xf32, #tpu.memory_space<vmem>>, vector<1x128xf32>
    tpu.vector_store %arg5[%c0_19, %c0_20], %66 {strides = array<i32>} : memref<1x128xf32, #tpu.memory_space<vmem>>, vector<1x128xf32>,
    %c0_i32_21 = arith.constant 0 : i32
    %68 = arith.cmpi eq, %arg1, %c0_i32_21 : i32
    %69 = arith.extui %68 : i1 to i32
    %c0_i32_22 = arith.constant 0 : i32
    %70 = arith.cmpi ne, %69, %c0_i32_22 : i32
    scf.if %70 {
      %c0_23 = arith.constant 0 : index
      %c0_24 = arith.constant 0 : index
      %71 = vector.load %arg5[%c0_23, %c0_24] : memref<1x128xf32, #tpu.memory_space<vmem>>, vector<1x128xf32>
      %72 = vector.shape_cast %71 : vector<1x128xf32> to vector<1x1x128xf32>
      %cst_25 = arith.constant dense<0.000000e+00> : vector<1xf32>
      %73 = vector.multi_reduction <add>, %72, %cst_25 [1, 2] : vector<1x1x128xf32> to vector<1xf32>
      %74 = vector.shape_cast %73 : vector<1xf32> to vector<1x1x1xf32>
      %75 = vector.extract %74[0, 0, 0] : f32 from vector<1x1x1xf32>
      %76 = vector.broadcast %75 : f32 to vector<1x1x1xf32>
      %c0_26 = arith.constant 0 : index
      %c0_27 = arith.constant 0 : index
      %c0_28 = arith.constant 0 : index
      %77 = vector.load %arg4[%c0_26, %c0_27, %c0_28] : memref<1x1x1xf32, #tpu.memory_space<vmem>>, vector<1x1x1xf32>
      tpu.vector_store %arg4[%c0_26, %c0_27, %c0_28], %76 {strides = array<i32>} : memref<1x1x1xf32, #tpu.memory_space<vmem>>, vector<1x1x1xf32>,
    } else {
    }
    return
  }
  func.func @transform_0(%arg0: i32, %arg1: i32) -> (i32, i32) {
    %c1_i32 = arith.constant 1 : i32
    %0 = arith.muli %arg0, %c1_i32 : i32
    %1 = arith.addi %0, %arg1 : i32
    %c0_i32 = arith.constant 0 : i32
    %c0_i32_0 = arith.constant 0 : i32
    return %c0_i32, %1 : i32, i32
  }
  func.func @transform_1(%arg0: i32, %arg1: i32) -> (i32, i32) {
    %c1_i32 = arith.constant 1 : i32
    %0 = arith.muli %arg0, %c1_i32 : i32
    %1 = arith.addi %0, %arg1 : i32
    %c0_i32 = arith.constant 0 : i32
    %c0_i32_0 = arith.constant 0 : i32
    return %c0_i32, %1 : i32, i32
  }
  func.func @transform_2(%arg0: i32, %arg1: i32) -> (i32, i32, i32) {
    %c0_i32 = arith.constant 0 : i32
    %c0_i32_0 = arith.constant 0 : i32
    %c0_i32_1 = arith.constant 0 : i32
    return %arg0, %c0_i32, %c0_i32_0 : i32, i32, i32
  }
}

</mosaic_0001>

<bundles_post_ra>
// kernel: tpu_custom_call.1
= control target key start
LH: loop header
LB: loop body
LE: loop exit
PB: predicated region body
PF: predicated region fallthrough
CT: control target
= control target key end

     0   :  { %7 = vsyncpa [#allocation4], 0  ;;  %s724_s0 = inlined_call_operand.hbm [shape: f32[16,256], index: 0, kind: input, shape index: {}]   ;;  %s725_s1 = inlined_call_operand.vmem [shape: f32[1,256], index: 1, kind: input, shape index: {}]   ;;  %s726_s2 = inlined_call_operand.vmem [shape: f32[2,1,1], index: 2, kind: output, shape index: {}]  }
   0x1   :  { %9 = vsyncpa [#allocation4 + $0x1], 0  ;;  %s584_s9 = smov 0   ;;  %s586_s10 = smov 0  }
   0x2   :  { %s588_s11 = smov 0   ;;  %s590_s12 = smov 0  }
   0x3   :  { %s592_s13 = smov 0   ;;  %s594_s14 = smov 0  }
   0x4 LB: > { %s393_s15 = sadd.s32 4294967295, %s562_s14   ;;  %s27_s16 = sadd.s32 1, %s558_s13  ;;  %s562_s14 = sphi %s594_s14, %s15_s14   ;;  %s558_s13 = sphi %s592_s13, %s735_s13   ;;  %s554_s12 = sphi %s590_s12, %s734_s12   ;;  %s550_s11 = sphi %s588_s11, %s733_s11   ;;  %s546_s10 = sphi %s586_s10, %s732_s10   ;;  %s542_s9 = sphi %s584_s9, %s731_s9  }
   0x5   : > { %p29_p0 = scmp.ge.s32.totalorder %s27_s16, 2  ;;  %s36_s17 = sadd.s32 1, %s550_s11 }
   0x6   : > { %p43_p1 = scmp.ne.s32.totalorder %s550_s11, %s546_s10  ;;  %p44_p2 = scmp.eq.s32.totalorder %s562_s14, 0 }
   0x7   : > { %s737_s16 = smov (%p29_p0, %s27_s16), 0  ;;  %p49_p4 = scmp.ne.s32.totalorder %s546_s10, %s542_s9 }
   0x8   : > { %p620_p3 = por %p44_p2, %p43_p1  ;;  %s33_s19 = ssub.s32 %s558_s13, %s737_s16 }
   0x9   : > { %p50_p5 = scmp.eq.s32.totalorder %s393_s15, 0  ;;  %p34_p6 = scmp.eq.s32.totalorder %s33_s19, 0 }
   0xa   : > { %p417_p8 = scmp.lt.s32.totalorder %s562_s14, 2  ;;  %s127_s22 = sand.u32 1, %s550_s11  }
   0xb   : > { %p627_p7 = por %p50_p5, %p49_p4  ;;  %s398_s23 = sshll.u32 %s558_s13, 7 }
   0xc   : > { %s633_s21 = scalar_select %p34_p6, %s550_s11, %s36_s17  }
   0xd   : > { %s397_s24 = sshll.u32 %s127_s22, 4  ;;  %s640_s27 = scalar_lea.hbm %s724_s0, %s398_s23 }
   0xe   : > { %s131_s28 = scalar_lea.vmem [#allocation3], %s397_s24  ;;  %p644_p9 = pnand %p417_p8, %p620_p3 }
   0xf   : > { %s138_s29 = sshll.u32 %s131_s28, 4  ;;  %s651_s3 = scalar_lea.sflag [#allocation4], %s127_s22  ;;  %s648_s29 = int_to_ptr.vmem [resolvable:$true] %s138_s29 }
  0x10   : > { %s482_s4 = scalar_lea.hbm %s640_s27, 256  ;;  %p484_p12 = pneg %p644_p9 }
  0x11   : > { %p483_p11 = scmp.ne.s32.totalorder %s640_s27, %s482_s4  ;;  %s487_s7 = scalar_lea.hbm %s724_s0, 512 }
  0x12   : > { %p488_p1 = scmp.lt.u32.totalorder %s640_s27, %s724_s0  ;;  %p489_p2 = scmp.lt.u32.totalorder %s487_s7, %s482_s4 }
  0x13   : > { %p485_p13 = pnand %p484_p12, %p483_p11  ;;  %p491_p4 = scmp.lt.u32.totalorder %s482_s4, %s640_s27 }
  0x14   : > { %p490_p3 = por %p489_p2, %p488_p1 }
  0x15   : > { %p486_p0 = pneg %p485_p13 }
  0x16   : > { %p492_p5 = por %p491_p4, %p490_p3 }
  0x18   : > { %p493_p6 = pnand %p492_p5, %p486_p0 }
  0x1a   : > { %496 = shalt.err (!%p493_p6)
}
  0x1b   : > { %s497_s15 = scalar_lea.vmem %s648_s29, 256  ;;  %s564_s17 = smov [#allocation3]  }
  0x1c   : > { %p498_p8 = scmp.ne.s32.totalorder %s648_s29, %s497_s15  ;;  %s502_s18 = sshll.u32 %s564_s17, 4  ;;  %s503_s18 = int_to_ptr.vmem [resolvable:$false] %s502_s18 }
  0x1d   : > { %s504_s19 = scalar_lea.vmem %s503_s18, 512  ;;  %p505_p10 = scmp.lt.s32.totalorder %s648_s29, %s503_s18 }
  0x1e   : > { %p500_p11 = pnand %p498_p8, %p484_p12  ;;  %p506_p1 = scmp.lt.s32.totalorder %s504_s19, %s497_s15 }
  0x20   : > { %p501_p13 = pneg %p500_p11  ;;  %p507_p2 = por %p506_p1, %p505_p10 }
  0x22   : > { %p508_p3 = pnand %p507_p2, %p501_p13 }
  0x24   : > { %511 = shalt.err (!%p508_p3)
}
  0x25   : > { %s565_s22 = smov 256   ;;  %s566_s23 = smov 128  }
  0x26   : > { %s567_s24 = smov 8   ;;  %p154_p12 = scmp.lt.s32.totalorder %s562_s14, 3 }
  0x27   : > { %416 = dma.hbm_to_vmem [thread:$0]  (!%p644_p9), %s640_s27, 256, %s648_s29, %s651_s3, %s565_s22, %s566_s23, %s567_s24  }
  0x28   : > { %p730_p0 = scmp.ge.s32.totalorder %s562_s14, 1 }
  0x2a   : > { %p155_p4 = pnand %p730_p0, %p154_p12 }
  0x2b   : > { %s160_s25 = sand.u32 (!%p155_p4), 1, %s546_s10  }
  0x2c   : > { %158 = sbr.rel (%p155_p4) target bundleno = 380 (0x17c), region = 28  ;;  %s400_s26 = sshll.u32 (!%p155_p4), %s160_s25, 4 }
  0x2d   : > { %s161_s28 = scalar_lea.sflag (!%p155_p4), [#allocation4], %s160_s25  ;;  %s164_s4 = scalar_lea.vmem (!%p155_p4), [#allocation3], %s400_s26 }
  0x33   : > { %537 = dma.done.wait (%p627_p7), %s161_s28, 256  }
  0x34   : > { %539 = vsyncadd (%p627_p7), %s161_s28, 4294967040  ;;  %v568_v0 = vmov 0.0   ;;  %v201_v1 = vld [vmem:[%s164_s4] sm:$0xff]  ;;  %v202_v2 = vld [vmem:[%s164_s4 + $0x8] sm:$0xff]  ;;  %p189_p7 = scmp.lt.s32.totalorder %s554_s12, 1  ;;  %v206_v26 = vlaneseq  ;;  %s401_s3 = sshll.u32 %s554_s12, 7 }
  0x35   : > { %200 = vst [vmem:[#allocation2] sm:$0x1] %v568_v0  ;;  %v213_v3 = vmax.f32 %v201_v1, %v202_v2  ;;  %vm302_vm3 = vcmask 1040384   ;;  %vm314_vm4 = vcmask 0  }
  0x36   : > { %s690_s20 = scalar_select %p189_p7, %s554_s12, 1  ;;  %v246_v28 = vshrl.u32 %v206_v26, 7 }
  0x37   : > { %v214_v4 = vrot.slane %v213_v3, 4 }
  0x38   : > { %s191_s30 = scalar_lea.vmem %s725_s1, %s690_s20  ;;  %v247_v30 = vadd.s32 8, %v246_v28  ;;  %v277_v34 = vcvt.s32.f32 %v246_v28  ;;  %v250_v44 = vsub.s32 0, %v246_v28  ;;  %s195_s6 = scalar_lea.vmem %s726_s2, %s690_s20 }
  0x39   : > { %v215_v5 = vmax.f32 %v213_v3, %v214_v4  ;;  %v696_v19 = vld [vmem:[%s191_s30] sm:$0x1] }
  0x3a   : > { %v239_v22 = vadd.f32 24.0, %v696_v19  ;;  %v278_v35 = vcvt.s32.f32 %v247_v30  ;;  %v403_v39 = vadd.f32 -7.5, %v277_v34 }
  0x3b   : > { %v216_v6 = vrot.slane %v215_v5, 2 }
  0x3c   : > { %v240_v25 = vmul.f32 0.33333334, %v239_v22  ;;  %v404_v40 = vadd.f32 -7.5, %v278_v35 }
  0x3d   : > { %v217_v7 = vmax.f32 %v215_v5, %v216_v6 }
  0x3e   : > { %v241_v27 = vfloor.f32 %v240_v25 }
  0x3f   : > { %v218_v8 = vrot.slane %v217_v7, 1 }
  0x40   : > { %v242_v29 = vmax.f32 %v241_v27, 0.0 }
  0x41   : > { %v219_v9 = vmax.f32 %v217_v7, %v218_v8 }
  0x42   : > { %v243_v32 = vmin.f32 %v242_v29, 15.0 }
  0x43   : > { %v220_v10 = vsub.f32 %v201_v1, %v219_v9  ;;  %v221_v11 = vsub.f32 %v202_v2, %v219_v9 }
  0x44   : > { %v407_v37 = vtrunc.f32 %v243_v32 }
  0x45   : > { %v222_v12 = vmul.f32 1.442695, %v220_v10  ;;  %v224_v13 = vmul.f32 1.442695, %v221_v11  ;;  %v207_v10 = vand.u32 127, %v206_v26 }
  0x46   : > { %v408_v43 = vcvt.f32.s32 %v407_v37 }
  0x47   : > { %470 = vpow2.f32 %v222_v12  ;;  %v208_v12 = vstv %s401_s3 }
  0x48   : > { %472 = vpow2.f32 %v224_v13  ;;  %v251_v49 = vrot.slane %v408_v43, %v250_v44 }
  0x4a   : > { %vm252_vm0 = vcmp.eq.s32.totalorder %v246_v28, %v251_v49  ;;  %vm253_vm1 = vcmp.eq.s32.totalorder %v247_v30, %v251_v49 }
  0x51   : > { %v471_v14 = vpop.eup %470 }
  0x52   : > { %v473_v15 = vpop.eup %472 }
  0x53   : > { %v226_v16 = vadd.f32 %v473_v15, %v471_v14 }
  0x55   : > { %v227_v17 = vrot.slane %v226_v16, 4 }
  0x57   : > { %v228_v18 = vadd.f32 %v227_v17, %v226_v16 }
  0x59   : > { %v229_v20 = vrot.slane %v228_v18, 2 }
  0x5b   : > { %v230_v21 = vadd.f32 %v229_v20, %v228_v18 }
  0x5d   : > { %v231_v23 = vrot.slane %v230_v21, 1 }
  0x5f   : > { %v232_v24 = vadd.f32 %v231_v23, %v230_v21 }
  0x61   : > { %474 = vrcp.f32 %v232_v24 }
  0x6b   : > { %v475_v31 = vpop.eup %474 }
  0x6c   : > { %v234_v33 = vmul.f32 %v475_v31, %v232_v24  ;;  %v293_v24 = vld [vmem:[#allocation2] sm:$0x1] }
  0x6e   : > { %v235_v36 = vsub.f32 2.0, %v234_v33 }
  0x70   : > { %v236_v38 = vmul.f32 %v475_v31, %v235_v36 }
  0x72   : > { %v237_v41 = vmul.f32 %v471_v14, %v236_v38  ;;  %v238_v42 = vmul.f32 %v473_v15, %v236_v38  ;;  %v209_v14 = vadd.s32 %v208_v12, %v207_v10 }
  0x74   : > { %v263_v45 = vmul.f32 1.442695, %v237_v41  ;;  %v265_v46 = vmul.f32 1.442695, %v238_v42  ;;  %v281_v47 = vmul.f32 %v403_v39, %v237_v41  ;;  %v282_v48 = vmul.f32 %v404_v40, %v238_v42 }
  0x75   : > { %v254_v52 = vsel %vm252_vm0, %v237_v41, 0.0  ;;  %v255_v53 = vsel %vm253_vm1, %v238_v42, 0.0  ;;  %vm210_vm2 = vcmp.lt.s32.totalorder %v209_v14, 8 }
  0x76   : > { %476 = vpow2.f32 %v263_v45  ;;  %v283_v50 = vadd.f32 %v282_v48, %v281_v47  ;;  %v256_v57 = vadd.f32 %v255_v53, %v254_v52  ;;  %v402_v22 = vsel %vm210_vm2, 1.0, %v568_v0 }
  0x77   : > { %478 = vpow2.f32 %v265_v46 }
  0x78   : > { %v284_v51 = vrot.slane %v283_v50, 4  ;;  %v257_v61 = vrot.slane %v256_v57, 4 }
  0x7a   : > { %v285_v54 = vadd.f32 %v284_v51, %v283_v50  ;;  %v258_v2 = vadd.f32 %v257_v61, %v256_v57 }
  0x7c   : > { %v286_v59 = vrot.slane %v285_v54, 2  ;;  %v259_v6 = vrot.slane %v258_v2, 2 }
  0x7e   : > { %v287_v63 = vadd.f32 %v286_v59, %v285_v54  ;;  %v260_v9 = vadd.f32 %v259_v6, %v258_v2 }
  0x80   : > { %v477_v55 = vpop.eup %476  ;;  %v288_v4 = vrot.slane %v287_v63, 1  ;;  %v261_v13 = vrot.slane %v260_v9, 1 }
  0x81   : > { %v479_v56 = vpop.eup %478 }
  0x82   : > { %v267_v58 = vadd.f32 %v479_v56, %v477_v55  ;;  %v289_v8 = vadd.f32 %v288_v4, %v287_v63  ;;  %v262_v16 = vadd.f32 %v261_v13, %v260_v9 }
  0x84   : > { %v268_v60 = vrot.slane %v267_v58, 4  ;;  %v290_v11 = vmul.f32 3.0, %v289_v8 }
  0x86   : > { %v269_v62 = vadd.f32 %v268_v60, %v267_v58  ;;  %v291_v15 = vsub.f32 %v290_v11, %v696_v19 }
  0x88   : > { %v270_v1 = vrot.slane %v269_v62, 2  ;;  %v292_v20 = vand.u32 2147483647, %v291_v15 }
  0x8a   : > { %v271_v3 = vadd.f32 %v270_v1, %v269_v62 }
  0x8c   : > { %v272_v5 = vrot.slane %v271_v3, 1 }
  0x8e   : > { %v273_v7 = vadd.f32 %v272_v5, %v271_v3 }
  0x90   : > { %480 = vlog2.f32 %v273_v7 }
  0x9a   : > { %v481_v17 = vpop.eup %480 }
  0x9b   : > { %v275_v18 = vmul.f32 0.6931472, %v481_v17 }
  0x9d   : > { %v276_v21 = vsub.f32 %v275_v18, %v262_v16 }
  0x9f   : > { %v294_v23 = vadd.f32 %v292_v20, %v276_v21 }
  0xa1   : > { %v295_v25 = vmul.f32 %v402_v22, %v294_v23 }
  0xa3   : > { %v296_v27 = vadd.f32 %v295_v25, %v293_v24 }
  0xa5   : > { %297 = vst [vmem:[#allocation2] sm:$0x1] %v296_v27 }
  0xac   : > { %v301_v26 = vld [vmem:[#allocation2] sm:$0x1] }
  0xad   : > { %v303_v28 = vsel %vm302_vm3, %v301_v26, 0.0 }
  0xae   : > { %304 = vadd.xlane.f32.xlu0 %v303_v28 }
 0x13b   : > { %v305_v29 = vpop.xlane.xlu0 %304 }
 0x13c   : > { %v306_v19 = vrot.slane %v305_v29, 4 }
 0x13e   : > { %v307_v30 = vadd.f32 %v306_v19, %v305_v29 }
 0x140   : > { %v308_v31 = vrot.slane %v307_v30, 2 }
 0x142   : > { %v309_v32 = vadd.f32 %v308_v31, %v307_v30 }
 0x144   : > { %v310_v33 = vrot.slane %v309_v32, 1 }
 0x146   : > { %v311_v34 = vadd.f32 %v310_v33, %v309_v32 }
 0x148   : > { %409 = vpush %v311_v34 }
 0x179   : > { %s410_s7 = spop %409 }
 0x17a   : > { %v313_v0 = vstv %s410_s7 }
 0x17b   : > { %315 = vst.msk [vmem:[%s195_s6] sm:$0x1] %vm314_vm4, %v313_v0 }
 0x17c PF: > { %s15_s14 = sadd.s32 1, %s562_s14   ;;  %s731_s9 = smov %s546_s10 }
 0x17d   : > { %p12_p9 = scmp.ge.s32.totalorder %s15_s14, 4   ;;  %s732_s10 = smov %s550_s11 }
 0x17e   : > { %s733_s11 = smov %s633_s21  ;;  %s734_s12 = smov %s558_s13 }
 0x17f   : > { %s735_s13 = smov %s737_s16  ;;  %14 = sbr.rel (!%p12_p9) target bundleno = 4 (0x4), region = 79 }
 0x186   :  { %333 = vsyncpa [#allocation4], 1 }
 0x187   :  { %335 = vsyncpa [#allocation4 + $0x1], 1 }

</bundles_post_ra>
